<compile_context>
chip_gen: v7x
topology: tpu7x:2x2x1
jax: 0.10.0
libtpu: 0.0.40
codegen_flags: <defaults>
</compile_context>

<pallas_src>
import functools
import math

import numpy as np
import jax
import jax.numpy as jnp
from jax.experimental import pallas as pl
from jax.experimental.pallas import tpu as pltpu


# -----------------------------------------------------------------------------
# Host-side (trace-time) constant construction
# -----------------------------------------------------------------------------
def _lm_lists(L_upper, num_atoms):
    ms = [m for l in range(L_upper + 1) for m in range(-l, l + 1)][:num_atoms]
    ls = [l for l in range(L_upper + 1) for m in range(-l, l + 1)][:num_atoms]
    return ls, ms


def _assoc_legendre_poly_coeffs(L):
    """Q[l][m]: coeffs (ascending in x) with P_l^m(x) = (1-x^2)^{m/2} * Q[l][m](x)."""
    Q = [[None] * (L + 1) for _ in range(L + 1)]
    for m in range(L + 1):
        dfact = 1.0
        for k in range(1, 2 * m, 2):
            dfact *= k
        Q[m][m] = np.array([((-1.0) ** m) * dfact])          # Condon-Shortley
        if m + 1 <= L:
            Q[m + 1][m] = np.array([0.0, (2 * m + 1) * Q[m][m][0]])
        for l in range(m + 2, L + 1):
            a, b = Q[l - 1][m], Q[l - 2][m]
            q = np.zeros(l - m + 1)
            q[1:1 + len(a)] += (2 * l - 1) * a
            q[:len(b)] -= (l + m - 1) * b
            Q[l][m] = q / (l - m)
    return Q


def _build_constants(ls, ms, L, a_pad, ct_pad, az_pad, r_pad):
    """Per-channel coefficient / selection matrices (normalization folded in).

    Qmat  [a_pad, ct_pad] : coefficients of the normalized Legendre polynomial
                            (in powers of cos(theta)) for each channel.
    AZsel [a_pad, az_pad] : one-hot pick of sin^j(theta)*{cos,sin}(j*phi) row.
    RSel  [a_pad, r_pad]  : one-hot pick of the r^{-(l+1)} row.
    """
    Q = _assoc_legendre_poly_coeffs(L)
    qmat = np.zeros((a_pad, ct_pad), dtype=np.float64)
    azsel = np.zeros((a_pad, az_pad), dtype=np.float32)
    rsel = np.zeros((a_pad, r_pad), dtype=np.float32)
    for ch, (l, m) in enumerate(zip(ls, ms)):
        am = abs(m)
        K = math.sqrt((2 * l + 1) / (4.0 * math.pi)
                      * math.factorial(l - am) / math.factorial(l + am))
        norm = K if m == 0 else math.sqrt(2.0) * K
        for a, c in enumerate(Q[l][am]):
            qmat[ch, a] += norm * c
        # azimuthal row order in-kernel: [ (0,cos), (1,cos), (1,sin), (2,cos), (2,sin), ... ]
        az_idx = 0 if am == 0 else (2 * am - 1 if m >= 0 else 2 * am)
        azsel[ch, az_idx] = 1.0
        rsel[ch, l] = 1.0
    return qmat.astype(np.float32), azsel, rsel


def _round_up(v, m):
    return ((v + m - 1) // m) * m


# -----------------------------------------------------------------------------
# Kernel helpers
# -----------------------------------------------------------------------------
def _stack_rows(rows, num_rows_padded):
    """Stack a list of (1, n) rows into (num_rows_padded, n).

    Uses iota + select (pure VPU, dense shapes) instead of sublane concatenation
    or scratch row-stores; padding rows are zero.
    """
    n = rows[0].shape[-1]
    row_id = jax.lax.broadcasted_iota(jnp.int32, (num_rows_padded, n), 0)
    out = jnp.zeros((num_rows_padded, n), jnp.float32)
    for i, r in enumerate(rows):
        out = jnp.where(row_id == i, r, out)
    return out


# -----------------------------------------------------------------------------
# Kernel
# -----------------------------------------------------------------------------
def _ish_kernel(x_ref, qmat_ref, azsel_ref, rsel_ref, o_ref, *, L):
    # x_ref: (3, block_n) rows = (r, theta, phi); outputs: (A_pad, block_n).
    x = x_ref[...]
    r = x[0:1, :]
    th = x[1:2, :]
    ph = x[2:3, :]

    # 5 transcendental-class ops per point total.
    ct = jnp.cos(th)
    st = jnp.sqrt(jnp.maximum(1.0 - ct * ct, 0.0))     # sin(theta) >= 0 convention
    cp = jnp.cos(ph)
    sp = jnp.sin(ph)
    inv_r = 1.0 / r                                     # r^{-(l+1)} via multiply ladder

    # power ladders (each row is a lane-dense (1, block_n) value)
    ctp = [jnp.ones_like(ct)]
    stp = [jnp.ones_like(st)]
    for _ in range(L):
        ctp.append(ctp[-1] * ct)
        stp.append(stp[-1] * st)
    rp = [inv_r]                                        # rp[l] = r^{-(l+1)}
    for _ in range(L):
        rp.append(rp[-1] * inv_r)

    # cos(j*phi), sin(j*phi) via angle-addition recurrence (no per-channel cos)
    cosm = [jnp.ones_like(cp)]
    sinm = [jnp.zeros_like(sp)]
    if L >= 1:
        cosm.append(cp)
        sinm.append(sp)
        for _ in range(L - 1):
            c_prev, s_prev = cosm[-1], sinm[-1]
            cosm.append(c_prev * cp - s_prev * sp)
            sinm.append(s_prev * cp + c_prev * sp)

    # azimuthal factor rows: sin^j(theta) * {cos, sin}(j*phi), host-matched order
    az_rows = [stp[0] * cosm[0]]
    for j in range(1, L + 1):
        az_rows.append(stp[j] * cosm[j])
        az_rows.append(stp[j] * sinm[j])

    ct_pad = qmat_ref.shape[1]
    az_pad = azsel_ref.shape[1]
    r_pad = rsel_ref.shape[1]

    ctmat = _stack_rows(ctp, ct_pad)      # (ct_pad, block_n)
    azmat = _stack_rows(az_rows, az_pad)  # (az_pad, block_n)
    rpmat = _stack_rows(rp, r_pad)        # (r_pad,  block_n)

    # Channel mixing on the MXU (outputs are (A_pad, block_n), lane dense).
    leg = jnp.dot(qmat_ref[...], ctmat, preferred_element_type=jnp.float32)
    azf = jnp.dot(azsel_ref[...], azmat, preferred_element_type=jnp.float32)
    rad = jnp.dot(rsel_ref[...], rpmat, preferred_element_type=jnp.float32)

    o_ref[...] = (leg * azf * rad).astype(o_ref.dtype)


# -----------------------------------------------------------------------------
# Wrapper
# -----------------------------------------------------------------------------
def _vmem_limit_bytes():
    """Generation-aware vmem cap: ~half physical (32 MiB on v7x, 64 MiB v5e/v6e)."""
    phys = None
    try:
        phys = getattr(pltpu.get_tpu_info(), "vmem_capacity_bytes", None)
    except Exception:
        phys = None
    if not phys:
        phys = 128 * 1024 * 1024
    return int(min(64 * 1024 * 1024, max(32 * 1024 * 1024, int(phys) // 2)))


def irregular_solid_harmonics_pe(x, *, L=None, num_atoms=None,
                                 block_n=1024, out_dtype=jnp.float32):
    """IrregularSolidHarmonicsPE forward. x: (..., 3) = (r, theta, phi).

    out_dtype=jnp.bfloat16 halves HBM writeback (useful on v5e/v6e) while the
    kernel still accumulates in f32; default matches the torch module (f32).
    """
    if num_atoms is None:
        if L is None:
            raise ValueError("Either `num_atoms` or `L` must be provided.")
        num_atoms = (L + 1) ** 2
    L_upper = L if L is not None else math.ceil(math.sqrt(num_atoms)) - 1
    ls, ms = _lm_lists(L_upper, num_atoms)
    A = len(ls)

    assert x.shape[-1] == 3, "input must be (..., 3) = (r, theta, phi)"
    lead_shape = x.shape[:-1]
    xf = x.reshape(-1, 3).astype(jnp.float32)
    N = xf.shape[0]

    a_pad = _round_up(max(A, 1), 8)
    ct_pad = _round_up(L_upper + 1, 8)
    az_pad = _round_up(2 * L_upper + 1, 8)
    r_pad = _round_up(L_upper + 1, 8)

    qmat_np, azsel_np, rsel_np = _build_constants(ls, ms, L_upper,
                                                  a_pad, ct_pad, az_pad, r_pad)
    qmat = jnp.asarray(qmat_np)
    azsel = jnp.asarray(azsel_np)
    rsel = jnp.asarray(rsel_np)

    # ---- tile sizing (accounts for sublane padding of the (3, bn) input tile,
    # the double-buffered in/out tiles, the three stacked matrices and the
    # row-shaped temporaries) ----
    bytes_per_point = 4 * (2 * 8                      # (3->8, bn) input, 2 buffers
                           + 5 * a_pad                # out x2 + leg/azf/rad
                           + (ct_pad + az_pad + r_pad)
                           + 8 * (5 * L_upper + 8))   # row temps, sublane padded
    budget = 24 * 1024 * 1024
    cap = max(128, (budget // bytes_per_point) // 128 * 128)

    bn = max(128, min(block_n, cap, _round_up(N, 128)))
    bn = max(128, (bn // 128) * 128)
    # v7x megacore: make sure there are >= 2 grid tiles whenever N allows it.
    if N > 128 and -(-N // bn) < 2:
        bn = max(128, _round_up(-(-N // 2), 128))
    num_tiles = -(-N // bn)
    n_pad = num_tiles * bn

    # Transpose to points-on-lanes layout (3, n_pad); pad tail points with
    # r = theta = phi = 1 (keeps 1/r finite), fused by XLA with the transpose.
    xt = jnp.pad(xf, ((0, n_pad - N), (0, 0)), constant_values=1.0).T

    kernel = functools.partial(_ish_kernel, L=L_upper)

    k_total = ct_pad + az_pad + r_pad
    cost = pl.CostEstimate(
        flops=int(2 * n_pad * a_pad * k_total
                  + 4 * n_pad * a_pad
                  + 30 * (L_upper + 1) * n_pad),
        transcendentals=int(5 * n_pad),
        bytes_accessed=int(4 * 3 * n_pad
                           + np.dtype(out_dtype).itemsize * a_pad * n_pad
                           + 4 * (qmat_np.size + azsel_np.size + rsel_np.size)),
    )

    out_t = pl.pallas_call(
        kernel,
        out_shape=jax.ShapeDtypeStruct((a_pad, n_pad), out_dtype),
        grid_spec=pltpu.PrefetchScalarGridSpec(
            num_scalar_prefetch=0,
            grid=(num_tiles,),
            in_specs=[
                pl.BlockSpec((3, bn), lambda i: (0, i)),          # point tile
                # grid-invariant constants (block index never changes -> no
                # per-step re-DMA by the pipeline)
                pl.BlockSpec((a_pad, ct_pad), lambda i: (0, 0)),
                pl.BlockSpec((a_pad, az_pad), lambda i: (0, 0)),
                pl.BlockSpec((a_pad, r_pad), lambda i: (0, 0)),
            ],
            out_specs=pl.BlockSpec((a_pad, bn), lambda i: (0, i)),
        ),
        compiler_params=pltpu.CompilerParams(
            dimension_semantics=("parallel",),
            vmem_limit_bytes=_vmem_limit_bytes(),
        ),
        cost_estimate=cost,
    )(xt, qmat, azsel, rsel)

    out = out_t.T[:N, :A]
    return out.reshape(*lead_shape, A)


# -----------------------------------------------------------------------------
# Plain-JAX reference (mirrors the PyTorch per-(l,m) loop, recurrence-based)
# -----------------------------------------------------------------------------
def _reference_irregular_solid_harmonics(x, L):
    ls, ms = _lm_lists(L, (L + 1) ** 2)
    r, theta, phi = x[..., 0], x[..., 1], x[..., 2]
    ct = jnp.cos(theta)
    st = jnp.sqrt(jnp.maximum(1.0 - ct * ct, 0.0))
    outs = []
    for l, m in zip(ls, ms):
        am = abs(m)
        p = jnp.ones_like(ct)
        for k in range(1, am + 1):                       # P_am^am
            p = p * (-(2.0 * k - 1.0)) * st
        if l > am:
            p_prev, p = p, (2.0 * am + 1.0) * ct * p     # P_{am+1}^am
            for ll in range(am + 2, l + 1):
                p_prev, p = p, ((2.0 * ll - 1.0) * ct * p
                                - (ll + am - 1.0) * p_prev) / (ll - am)
        K = math.sqrt((2 * l + 1) / (4.0 * math.pi)
                      * math.factorial(l - am) / math.factorial(l + am))
        if m == 0:
            y = K * p
        elif m > 0:
            y = math.sqrt(2.0) * K * p * jnp.cos(m * phi)
        else:
            y = math.sqrt(2.0) * K * p * jnp.sin(am * phi)
        outs.append(y * r ** (-(l + 1.0)))
    return jnp.stack(outs, axis=-1)


if __name__ == "__main__":
    L = 3                                  # num_atoms = (L+1)^2 = 16
    batch, pts = 2, 150                    # 300 points -> 2 tiles, exercises padding

    key = jax.random.PRNGKey(0)
    kr, kt, kp = jax.random.split(key, 3)
    r = jax.random.uniform(kr, (batch, pts), minval=0.5, maxval=2.0)
    theta = jax.random.uniform(kt, (batch, pts), minval=0.1, maxval=math.pi - 0.1)
    phi = jax.random.uniform(kp, (batch, pts), minval=-math.pi, maxval=math.pi)
    x = jnp.stack([r, theta, phi], axis=-1).astype(jnp.float32)

    out = irregular_solid_harmonics_pe(x, L=L)
    out = jax.block_until_ready(out)

    ref = _reference_irregular_solid_harmonics(x, L)
    assert out.shape == (batch, pts, (L + 1) ** 2), out.shape
    assert jnp.allclose(out, ref, atol=1e-3, rtol=1e-3), float(
        jnp.max(jnp.abs(out - ref)))

    print("KERNEL_OK")
</pallas_src>

<mosaic_0001>
module attributes {stable_mosaic.version = 11 : i64} {
  func.func @_ish_kernel(%arg0: i32, %arg1: memref<3x256xf32, #tpu.memory_space<vmem>>, %arg2: memref<16x8xf32, #tpu.memory_space<vmem>>, %arg3: memref<16x8xf32, #tpu.memory_space<vmem>>, %arg4: memref<16x8xf32, #tpu.memory_space<vmem>>, %arg5: memref<16x256xf32, #tpu.memory_space<vmem>>) attributes {dimension_semantics = [#tpu.dimension_semantics<parallel>], iteration_bounds = array<i64: 2>, scalar_prefetch = 0 : i64, scratch_operands = 0 : i64, tpu.core_type = #tpu.core_type<tc>, window_params = [{transform_indices = @transform_0, window_bounds = array<i64: 3, 256>}, {pipeline_mode = #tpu.pipeline_mode<synchronous>, transform_indices = @transform_1, window_bounds = array<i64: 16, 8>}, {pipeline_mode = #tpu.pipeline_mode<synchronous>, transform_indices = @transform_2, window_bounds = array<i64: 16, 8>}, {pipeline_mode = #tpu.pipeline_mode<synchronous>, transform_indices = @transform_3, window_bounds = array<i64: 16, 8>}, {transform_indices = @transform_4, window_bounds = array<i64: 16, 256>}]} {
    %c0 = arith.constant 0 : index
    %c0_0 = arith.constant 0 : index
    %0 = vector.load %arg1[%c0, %c0_0] : memref<3x256xf32, #tpu.memory_space<vmem>>, vector<3x256xf32>
    %1 = vector.extract_strided_slice %0 {offsets = [0, 0], sizes = [1, 256], strides = [1, 1]} : vector<3x256xf32> to vector<1x256xf32>
    %2 = vector.extract_strided_slice %0 {offsets = [1, 0], sizes = [1, 256], strides = [1, 1]} : vector<3x256xf32> to vector<1x256xf32>
    %3 = vector.extract_strided_slice %0 {offsets = [2, 0], sizes = [1, 256], strides = [1, 1]} : vector<3x256xf32> to vector<1x256xf32>
    %4 = math.cos %2 : vector<1x256xf32>
    %5 = arith.mulf %4, %4 : vector<1x256xf32>
    %cst = arith.constant 1.000000e+00 : f32
    %6 = vector.broadcast %cst : f32 to vector<1x256xf32>
    %7 = arith.subf %6, %5 : vector<1x256xf32>
    %cst_1 = arith.constant 0.000000e+00 : f32
    %8 = vector.broadcast %cst_1 : f32 to vector<1x256xf32>
    %9 = arith.maximumf %7, %8 : vector<1x256xf32>
    %10 = math.sqrt %9 : vector<1x256xf32>
    %11 = math.cos %3 : vector<1x256xf32>
    %12 = math.sin %3 : vector<1x256xf32>
    %cst_2 = arith.constant 1.000000e+00 : f32
    %13 = vector.broadcast %cst_2 : f32 to vector<1x256xf32>
    %14 = arith.divf %13, %1 : vector<1x256xf32>
    %cst_3 = arith.constant 1.000000e+00 : f32
    %15 = vector.broadcast %cst_3 : f32 to vector<1x256xf32>
    %cst_4 = arith.constant 1.000000e+00 : f32
    %16 = vector.broadcast %cst_4 : f32 to vector<1x256xf32>
    %17 = arith.mulf %15, %4 : vector<1x256xf32>
    %18 = arith.mulf %16, %10 : vector<1x256xf32>
    %19 = arith.mulf %17, %4 : vector<1x256xf32>
    %20 = arith.mulf %18, %10 : vector<1x256xf32>
    %21 = arith.mulf %19, %4 : vector<1x256xf32>
    %22 = arith.mulf %20, %10 : vector<1x256xf32>
    %23 = arith.mulf %14, %14 : vector<1x256xf32>
    %24 = arith.mulf %23, %14 : vector<1x256xf32>
    %25 = arith.mulf %24, %14 : vector<1x256xf32>
    %cst_5 = arith.constant 1.000000e+00 : f32
    %26 = vector.broadcast %cst_5 : f32 to vector<1x256xf32>
    %27 = arith.mulf %11, %11 : vector<1x256xf32>
    %28 = arith.mulf %12, %12 : vector<1x256xf32>
    %29 = arith.subf %27, %28 : vector<1x256xf32>
    %30 = arith.mulf %12, %11 : vector<1x256xf32>
    %31 = arith.mulf %11, %12 : vector<1x256xf32>
    %32 = arith.addf %30, %31 : vector<1x256xf32>
    %33 = arith.mulf %29, %11 : vector<1x256xf32>
    %34 = arith.mulf %32, %12 : vector<1x256xf32>
    %35 = arith.subf %33, %34 : vector<1x256xf32>
    %36 = arith.mulf %32, %11 : vector<1x256xf32>
    %37 = arith.mulf %29, %12 : vector<1x256xf32>
    %38 = arith.addf %36, %37 : vector<1x256xf32>
    %39 = arith.mulf %16, %26 : vector<1x256xf32>
    %40 = arith.mulf %18, %11 : vector<1x256xf32>
    %41 = arith.mulf %18, %12 : vector<1x256xf32>
    %42 = arith.mulf %20, %29 : vector<1x256xf32>
    %43 = arith.mulf %20, %32 : vector<1x256xf32>
    %44 = arith.mulf %22, %35 : vector<1x256xf32>
    %45 = arith.mulf %22, %38 : vector<1x256xf32>
    %46 = tpu.iota {dimensions = array<i32: 0>} : vector<8x256xi32>
    %cst_6 = arith.constant 0.000000e+00 : f32
    %47 = vector.broadcast %cst_6 : f32 to vector<8x256xf32>
    %c0_i32 = arith.constant 0 : i32
    %48 = vector.broadcast %c0_i32 : i32 to vector<8x256xi32>
    %49 = arith.cmpi eq, %46, %48 : vector<8x256xi32>
    %50 = vector.shape_cast %15 : vector<1x256xf32> to vector<1x256xf32>
    %51 = vector.broadcast %50 : vector<1x256xf32> to vector<8x256xf32>
    %52 = arith.select %49, %51, %47 : vector<8x256xi1>, vector<8x256xf32>
    %c1_i32 = arith.constant 1 : i32
    %53 = vector.broadcast %c1_i32 : i32 to vector<8x256xi32>
    %54 = arith.cmpi eq, %46, %53 : vector<8x256xi32>
    %55 = vector.shape_cast %17 : vector<1x256xf32> to vector<1x256xf32>
    %56 = vector.broadcast %55 : vector<1x256xf32> to vector<8x256xf32>
    %57 = arith.select %54, %56, %52 : vector<8x256xi1>, vector<8x256xf32>
    %c2_i32 = arith.constant 2 : i32
    %58 = vector.broadcast %c2_i32 : i32 to vector<8x256xi32>
    %59 = arith.cmpi eq, %46, %58 : vector<8x256xi32>
    %60 = vector.shape_cast %19 : vector<1x256xf32> to vector<1x256xf32>
    %61 = vector.broadcast %60 : vector<1x256xf32> to vector<8x256xf32>
    %62 = arith.select %59, %61, %57 : vector<8x256xi1>, vector<8x256xf32>
    %c3_i32 = arith.constant 3 : i32
    %63 = vector.broadcast %c3_i32 : i32 to vector<8x256xi32>
    %64 = arith.cmpi eq, %46, %63 : vector<8x256xi32>
    %65 = vector.shape_cast %21 : vector<1x256xf32> to vector<1x256xf32>
    %66 = vector.broadcast %65 : vector<1x256xf32> to vector<8x256xf32>
    %67 = arith.select %64, %66, %62 : vector<8x256xi1>, vector<8x256xf32>
    %68 = tpu.iota {dimensions = array<i32: 0>} : vector<8x256xi32>
    %cst_7 = arith.constant 0.000000e+00 : f32
    %69 = vector.broadcast %cst_7 : f32 to vector<8x256xf32>
    %c0_i32_8 = arith.constant 0 : i32
    %70 = vector.broadcast %c0_i32_8 : i32 to vector<8x256xi32>
    %71 = arith.cmpi eq, %68, %70 : vector<8x256xi32>
    %72 = vector.shape_cast %39 : vector<1x256xf32> to vector<1x256xf32>
    %73 = vector.broadcast %72 : vector<1x256xf32> to vector<8x256xf32>
    %74 = arith.select %71, %73, %69 : vector<8x256xi1>, vector<8x256xf32>
    %c1_i32_9 = arith.constant 1 : i32
    %75 = vector.broadcast %c1_i32_9 : i32 to vector<8x256xi32>
    %76 = arith.cmpi eq, %68, %75 : vector<8x256xi32>
    %77 = vector.shape_cast %40 : vector<1x256xf32> to vector<1x256xf32>
    %78 = vector.broadcast %77 : vector<1x256xf32> to vector<8x256xf32>
    %79 = arith.select %76, %78, %74 : vector<8x256xi1>, vector<8x256xf32>
    %c2_i32_10 = arith.constant 2 : i32
    %80 = vector.broadcast %c2_i32_10 : i32 to vector<8x256xi32>
    %81 = arith.cmpi eq, %68, %80 : vector<8x256xi32>
    %82 = vector.shape_cast %41 : vector<1x256xf32> to vector<1x256xf32>
    %83 = vector.broadcast %82 : vector<1x256xf32> to vector<8x256xf32>
    %84 = arith.select %81, %83, %79 : vector<8x256xi1>, vector<8x256xf32>
    %c3_i32_11 = arith.constant 3 : i32
    %85 = vector.broadcast %c3_i32_11 : i32 to vector<8x256xi32>
    %86 = arith.cmpi eq, %68, %85 : vector<8x256xi32>
    %87 = vector.shape_cast %42 : vector<1x256xf32> to vector<1x256xf32>
    %88 = vector.broadcast %87 : vector<1x256xf32> to vector<8x256xf32>
    %89 = arith.select %86, %88, %84 : vector<8x256xi1>, vector<8x256xf32>
    %c4_i32 = arith.constant 4 : i32
    %90 = vector.broadcast %c4_i32 : i32 to vector<8x256xi32>
    %91 = arith.cmpi eq, %68, %90 : vector<8x256xi32>
    %92 = vector.shape_cast %43 : vector<1x256xf32> to vector<1x256xf32>
    %93 = vector.broadcast %92 : vector<1x256xf32> to vector<8x256xf32>
    %94 = arith.select %91, %93, %89 : vector<8x256xi1>, vector<8x256xf32>
    %c5_i32 = arith.constant 5 : i32
    %95 = vector.broadcast %c5_i32 : i32 to vector<8x256xi32>
    %96 = arith.cmpi eq, %68, %95 : vector<8x256xi32>
    %97 = vector.shape_cast %44 : vector<1x256xf32> to vector<1x256xf32>
    %98 = vector.broadcast %97 : vector<1x256xf32> to vector<8x256xf32>
    %99 = arith.select %96, %98, %94 : vector<8x256xi1>, vector<8x256xf32>
    %c6_i32 = arith.constant 6 : i32
    %100 = vector.broadcast %c6_i32 : i32 to vector<8x256xi32>
    %101 = arith.cmpi eq, %68, %100 : vector<8x256xi32>
    %102 = vector.shape_cast %45 : vector<1x256xf32> to vector<1x256xf32>
    %103 = vector.broadcast %102 : vector<1x256xf32> to vector<8x256xf32>
    %104 = arith.select %101, %103, %99 : vector<8x256xi1>, vector<8x256xf32>
    %105 = tpu.iota {dimensions = array<i32: 0>} : vector<8x256xi32>
    %cst_12 = arith.constant 0.000000e+00 : f32
    %106 = vector.broadcast %cst_12 : f32 to vector<8x256xf32>
    %c0_i32_13 = arith.constant 0 : i32
    %107 = vector.broadcast %c0_i32_13 : i32 to vector<8x256xi32>
    %108 = arith.cmpi eq, %105, %107 : vector<8x256xi32>
    %109 = vector.shape_cast %14 : vector<1x256xf32> to vector<1x256xf32>
    %110 = vector.broadcast %109 : vector<1x256xf32> to vector<8x256xf32>
    %111 = arith.select %108, %110, %106 : vector<8x256xi1>, vector<8x256xf32>
    %c1_i32_14 = arith.constant 1 : i32
    %112 = vector.broadcast %c1_i32_14 : i32 to vector<8x256xi32>
    %113 = arith.cmpi eq, %105, %112 : vector<8x256xi32>
    %114 = vector.shape_cast %23 : vector<1x256xf32> to vector<1x256xf32>
    %115 = vector.broadcast %114 : vector<1x256xf32> to vector<8x256xf32>
    %116 = arith.select %113, %115, %111 : vector<8x256xi1>, vector<8x256xf32>
    %c2_i32_15 = arith.constant 2 : i32
    %117 = vector.broadcast %c2_i32_15 : i32 to vector<8x256xi32>
    %118 = arith.cmpi eq, %105, %117 : vector<8x256xi32>
    %119 = vector.shape_cast %24 : vector<1x256xf32> to vector<1x256xf32>
    %120 = vector.broadcast %119 : vector<1x256xf32> to vector<8x256xf32>
    %121 = arith.select %118, %120, %116 : vector<8x256xi1>, vector<8x256xf32>
    %c3_i32_16 = arith.constant 3 : i32
    %122 = vector.broadcast %c3_i32_16 : i32 to vector<8x256xi32>
    %123 = arith.cmpi eq, %105, %122 : vector<8x256xi32>
    %124 = vector.shape_cast %25 : vector<1x256xf32> to vector<1x256xf32>
    %125 = vector.broadcast %124 : vector<1x256xf32> to vector<8x256xf32>
    %126 = arith.select %123, %125, %121 : vector<8x256xi1>, vector<8x256xf32>
    %c0_17 = arith.constant 0 : index
    %c0_18 = arith.constant 0 : index
    %127 = vector.load %arg2[%c0_17, %c0_18] : memref<16x8xf32, #tpu.memory_space<vmem>>, vector<16x8xf32>
    %cst_19 = arith.constant dense<0.000000e+00> : vector<16x256xf32>
    %128 = tpu.matmul %127, %67, %cst_19 {dimension_numbers = #tpu.dot_dimension_numbers<[1], [0], [0], [1], [0, 0, 1, 1], [], []>} : vector<16x8xf32>, vector<8x256xf32>, vector<16x256xf32> -> vector<16x256xf32>
    %c0_20 = arith.constant 0 : index
    %c0_21 = arith.constant 0 : index
    %129 = vector.load %arg3[%c0_20, %c0_21] : memref<16x8xf32, #tpu.memory_space<vmem>>, vector<16x8xf32>
    %cst_22 = arith.constant dense<0.000000e+00> : vector<16x256xf32>
    %130 = tpu.matmul %129, %104, %cst_22 {dimension_numbers = #tpu.dot_dimension_numbers<[1], [0], [0], [1], [0, 0, 1, 1], [], []>} : vector<16x8xf32>, vector<8x256xf32>, vector<16x256xf32> -> vector<16x256xf32>
    %c0_23 = arith.constant 0 : index
    %c0_24 = arith.constant 0 : index
    %131 = vector.load %arg4[%c0_23, %c0_24] : memref<16x8xf32, #tpu.memory_space<vmem>>, vector<16x8xf32>
    %cst_25 = arith.constant dense<0.000000e+00> : vector<16x256xf32>
    %132 = tpu.matmul %131, %126, %cst_25 {dimension_numbers = #tpu.dot_dimension_numbers<[1], [0], [0], [1], [0, 0, 1, 1], [], []>} : vector<16x8xf32>, vector<8x256xf32>, vector<16x256xf32> -> vector<16x256xf32>
    %133 = arith.mulf %128, %130 : vector<16x256xf32>
    %134 = arith.mulf %133, %132 : vector<16x256xf32>
    %c0_26 = arith.constant 0 : index
    %c0_27 = arith.constant 0 : index
    %135 = vector.load %arg5[%c0_26, %c0_27] : memref<16x256xf32, #tpu.memory_space<vmem>>, vector<16x256xf32>
    tpu.vector_store %arg5[%c0_26, %c0_27], %134 {strides = array<i32>} : memref<16x256xf32, #tpu.memory_space<vmem>>, vector<16x256xf32>,
    return
  }
  func.func @transform_0(%arg0: i32) -> (i32, i32) {
    %c0_i32 = arith.constant 0 : i32
    %c0_i32_0 = arith.constant 0 : i32
    return %c0_i32, %arg0 : i32, i32
  }
  func.func @transform_1(%arg0: i32) -> (i32, i32) {
    %c0_i32 = arith.constant 0 : i32
    %c0_i32_0 = arith.constant 0 : i32
    %c0_i32_1 = arith.constant 0 : i32
    return %c0_i32, %c0_i32_0 : i32, i32
  }
  func.func @transform_2(%arg0: i32) -> (i32, i32) {
    %c0_i32 = arith.constant 0 : i32
    %c0_i32_0 = arith.constant 0 : i32
    %c0_i32_1 = arith.constant 0 : i32
    return %c0_i32, %c0_i32_0 : i32, i32
  }
  func.func @transform_3(%arg0: i32) -> (i32, i32) {
    %c0_i32 = arith.constant 0 : i32
    %c0_i32_0 = arith.constant 0 : i32
    %c0_i32_1 = arith.constant 0 : i32
    return %c0_i32, %c0_i32_0 : i32, i32
  }
  func.func @transform_4(%arg0: i32) -> (i32, i32) {
    %c0_i32 = arith.constant 0 : i32
    %c0_i32_0 = arith.constant 0 : i32
    return %c0_i32, %arg0 : i32, i32
  }
}

</mosaic_0001>

<bundles_post_ra>
// kernel: tpu_custom_call.1
= control target key start
LH: loop header
LB: loop body
LE: loop exit
PB: predicated region body
PF: predicated region fallthrough
CT: control target
= control target key end

     0   :  { %9 = vsyncpa [#allocation3], 0  ;;  %s2026_s0 = inlined_call_operand.hbm [shape: f32[3,512], index: 0, kind: input, shape index: {}]   ;;  %s2027_s1 = inlined_call_operand.hbm [shape: f32[16,8], index: 1, kind: input, shape index: {}]   ;;  %s2028_s2 = inlined_call_operand.hbm [shape: f32[16,8], index: 2, kind: input, shape index: {}]   ;;  %s2029_s3 = inlined_call_operand.hbm [shape: f32[16,8], index: 3, kind: input, shape index: {}]   ;;  %s2030_s4 = inlined_call_operand.hbm [shape: f32[16,512], index: 4, kind: output, shape index: {}]  }
   0x1   :  { %11 = vsyncpa [#allocation3 + $0x1], 0 }
   0x2   :  { %12 = vsyncpa [#allocation6], 0 }
   0x3   :  { %13 = vsyncpa [#allocation9], 0 }
   0x4   :  { %14 = vsyncpa [#allocation4], 0 }
   0x5   :  { %16 = vsyncpa [#allocation4 + $0x1], 0  ;;  %s1569_s15 = smov 0   ;;  %s1571_s16 = smov 0  }
   0x6   :  { %s1573_s17 = smov 0   ;;  %s1575_s18 = smov 0  }
   0x7 LB: > { %s1590_s19 = sadd.s32 4294967295, %s1525_s18   ;;  %s1192_s20 = sadd.s32 4294967294, %s1525_s18   ;;  %s1525_s18 = sphi %s1575_s18, %s2053_s18   ;;  %s1521_s17 = sphi %s1573_s17, %s2052_s17   ;;  %s1517_s16 = sphi %s1571_s16, %s2051_s16   ;;  %s1513_s15 = sphi %s1569_s15, %s2050_s15  }
   0x8   : > { %p42_p0 = scmp.ne.s32.totalorder %s1517_s16, %s1513_s15  ;;  %p2031_p1 = scmp.eq.s32.totalorder %s1590_s19, 0 }
   0x9   : > { %p135_p3 = scmp.eq.s32.totalorder %s1192_s20, 1  ;;  %p1193_p5 = scmp.ge.s32.totalorder %s1525_s18, 1 }
   0xa   : > { %p1599_p4 = por %p2031_p1, %p42_p0  ;;  %p142_p7 = scmp.lt.s32.totalorder %s1525_s18, 3 }
   0xb   : > { %p1604_p6 = por %p135_p3, %p42_p0  ;;  %s1527_s24 = smov [#allocation5]  }
   0xc   : > { %s2034_s21 = scalar_select %p1599_p4, 1, 0 }
   0xd   : > { %s2035_s22 = scalar_select %p1604_p6, 1, 0 }
   0xe   : > { %p1609_p8 = pnand %p1193_p5, %p142_p7  ;;  %s154_s25 = sshll.u32 %s1527_s24, 4  ;;  %s1613_s25 = int_to_ptr.vmem [resolvable:$true] %s154_s25 }
   0xf   : > { %s1528_s27 = smov [#allocation7]   ;;  %s1529_s29 = smov [#allocation8]  }
  0x10   : > { %s2036_s23 = scalar_select %p1609_p8, 1, 0 }
  0x11   : > { %p1256_p9 = pneg %p1609_p8  ;;  %s167_s28 = sshll.u32 %s1528_s27, 4  ;;  %s1624_s28 = int_to_ptr.vmem [resolvable:$true] %s167_s28 }
  0x12   : > { %s1626_s30 = sshll.u32 %s1529_s29, 4  ;;  %s1337_s7 = scalar_lea.hbm %s2027_s1, 256  ;;  %s181_s30 = int_to_ptr.vmem [resolvable:$true] %s1626_s30 }
  0x13   : > { %p1620_p11 = pnand %p1256_p9, %p2031_p1  ;;  %p1338_p12 = scmp.ne.s32.totalorder %s2027_s1, %s1337_s7 }
  0x14   : > { %p1344_p5 = scmp.lt.u32.totalorder %s1337_s7, %s2027_s1 }
  0x15   : > { %p1636_p13 = pneg %p1620_p11 }
  0x17   : > { %p1340_p0 = pnand %p1636_p13, %p1338_p12 }
  0x19   : > { %p1341_p3 = pneg %p1340_p0 }
  0x1b   : > { %p1346_p7 = pnand %p1344_p5, %p1341_p3 }
  0x1d   : > { %1349 = shalt.err (!%p1346_p7)
}
  0x1e   : > { %s1350_s13 = scalar_lea.vmem %s1613_s25, 256  ;;  %p1358_p2 = scmp.lt.s32.totalorder %s1613_s25, %s1613_s25 }
  0x1f   : > { %p1351_p9 = scmp.ne.s32.totalorder %s1613_s25, %s1350_s13  ;;  %p1359_p6 = scmp.lt.s32.totalorder %s1350_s13, %s1350_s13 }
  0x21   : > { %p1353_p10 = pnand %p1351_p9, %p1636_p13  ;;  %p1360_p12 = por %p1359_p6, %p1358_p2 }
  0x23   : > { %p1354_p1 = pneg %p1353_p10 }
  0x25   : > { %p1361_p0 = pnand %p1360_p12, %p1354_p1 }
  0x27   : > { %1364 = shalt.err (!%p1361_p0)
}
  0x28   : > { %s1530_s14 = smov 128   ;;  %s1531_s20 = smov 8  }
  0x29   : > { %1259 = dma.hbm_to_vmem [thread:$0]  (!%p1620_p11), %s2027_s1, 256, %s1613_s25, [#allocation6], %s1530_s14, %s1530_s14, %s1531_s20  }
  0x2a   : > { %s1365_s6 = scalar_lea.hbm %s2028_s2, 256 }
  0x2b   : > { %p1366_p1 = scmp.ne.s32.totalorder %s2028_s2, %s1365_s6  ;;  %p1372_p10 = scmp.lt.u32.totalorder %s1365_s6, %s2028_s2 }
  0x2d   : > { %p1368_p2 = pnand %p1366_p1, %p1636_p13 }
  0x2f   : > { %p1369_p6 = pneg %p1368_p2 }
  0x31   : > { %p1374_p3 = pnand %p1372_p10, %p1369_p6 }
  0x33   : > { %1377 = shalt.err (!%p1374_p3)
}
  0x34   : > { %s1378_s25 = scalar_lea.vmem %s1624_s28, 256  ;;  %p1386_p12 = scmp.lt.s32.totalorder %s1624_s28, %s1624_s28 }
  0x35   : > { %p1379_p5 = scmp.ne.s32.totalorder %s1624_s28, %s1378_s25  ;;  %p1387_p0 = scmp.lt.s32.totalorder %s1378_s25, %s1378_s25 }
  0x37   : > { %p1381_p7 = pnand %p1379_p5, %p1636_p13  ;;  %p1388_p1 = por %p1387_p0, %p1386_p12 }
  0x39   : > { %p1382_p9 = pneg %p1381_p7 }
  0x3b   : > { %p1389_p2 = pnand %p1388_p1, %p1382_p9 }
  0x3d   : > { %1392 = shalt.err (!%p1389_p2)
}
  0x3e   : > { %1262 = dma.hbm_to_vmem [thread:$0]  (!%p1620_p11), %s2028_s2, 256, %s1624_s28, [#allocation6], %s1530_s14, %s1530_s14, %s1531_s20  }
  0x3f   : > { %s1393_s29 = scalar_lea.hbm %s2029_s3, 256 }
  0x40   : > { %p1394_p6 = scmp.ne.s32.totalorder %s2029_s3, %s1393_s29  ;;  %p1400_p5 = scmp.lt.u32.totalorder %s1393_s29, %s2029_s3 }
  0x42   : > { %p1396_p10 = pnand %p1394_p6, %p1636_p13 }
  0x44   : > { %p1397_p3 = pneg %p1396_p10 }
  0x46   : > { %p1402_p7 = pnand %p1400_p5, %p1397_p3 }
  0x48   : > { %1405 = shalt.err (!%p1402_p7)
}
  0x49   : > { %s1406_s9 = scalar_lea.vmem %s181_s30, 256  ;;  %p1414_p1 = scmp.lt.s32.totalorder %s181_s30, %s181_s30 }
  0x4a   : > { %p1407_p9 = scmp.ne.s32.totalorder %s181_s30, %s1406_s9  ;;  %p1415_p2 = scmp.lt.s32.totalorder %s1406_s9, %s1406_s9 }
  0x4c   : > { %p1409_p12 = pnand %p1407_p9, %p1636_p13  ;;  %p1416_p4 = por %p1415_p2, %p1414_p1 }
  0x4e   : > { %p1410_p0 = pneg %p1409_p12 }
  0x50   : > { %p1417_p8 = pnand %p1416_p4, %p1410_p0 }
  0x52   : > { %1420 = shalt.err (!%p1417_p8)
}
  0x53   : > { %1265 = dma.hbm_to_vmem [thread:$0]  (!%p1620_p11), %s2029_s3, 256, %s181_s30, [#allocation9], %s1530_s14, %s1530_s14, %s1531_s20  }
  0x54   : > { %s1709_s10 = sadd.s32 1, %s1525_s18   ;;  %s29_s25 = sadd.s32 1, %s1521_s17 }
  0x55   : > { %s26_s26 = ssub.s32 %s1525_s18, %s1709_s10  ;;  %p36_p8 = scmp.ne.s32.totalorder %s1521_s17, %s1517_s16 }
  0x56   : > { %p27_p4 = scmp.eq.s32.totalorder %s26_s26, 0  ;;  %p37_p13 = scmp.eq.s32.totalorder %s1525_s18, 0 }
  0x57   : > { %p1277_p6 = scmp.lt.s32.totalorder %s1525_s18, 2  ;;  %p2039_p3 = scmp.eq.s32.totalorder %s1590_s19, 1 }
  0x58   : > { %s1719_s12 = scalar_select %p27_p4, %s1521_s17, %s29_s25  }
  0x59   : > { %p38_p10 = por %p37_p13, %p36_p8  ;;  %p1723_p5 = por %p2039_p3, %p36_p8 }
  0x5a   : > { %s194_s24 = sand.u32 1, %s1521_s17   ;;  %s1232_s27 = sshll.u32 %s1525_s18, 7 }
  0x5b   : > { %s1198_s30 = sshll.u32 %s194_s24, 3  ;;  %s1732_s29 = scalar_lea.hbm %s2026_s0, %s1232_s27 }
  0x5c   : > { %s198_s5 = scalar_lea.vmem [#allocation2], %s1198_s30  ;;  %p1734_p11 = pnand %p1277_p6, %p38_p10 }
  0x5d   : > { %s206_s6 = sshll.u32 %s198_s5, 4  ;;  %s195_s8 = scalar_lea.sflag [#allocation3], %s194_s24  ;;  %s1738_s6 = int_to_ptr.vmem [resolvable:$true] %s206_s6 }
  0x5e   : > { %s1421_s9 = scalar_lea.hbm %s1732_s29, 128  ;;  %p1423_p9 = pneg %p1734_p11 }
  0x5f   : > { %p1422_p7 = scmp.ne.s32.totalorder %s1732_s29, %s1421_s9  ;;  %s1426_s26 = scalar_lea.hbm %s2026_s0, 256 }
  0x60   : > { %p1427_p1 = scmp.lt.u32.totalorder %s1732_s29, %s2026_s0  ;;  %p1428_p2 = scmp.lt.u32.totalorder %s1426_s26, %s1421_s9 }
  0x61   : > { %p1424_p12 = pnand %p1423_p9, %p1422_p7  ;;  %p1430_p8 = scmp.lt.u32.totalorder %s1421_s9, %s1732_s29 }
  0x62   : > { %p1429_p4 = por %p1428_p2, %p1427_p1 }
  0x63   : > { %p1425_p0 = pneg %p1424_p12 }
  0x64   : > { %p1431_p13 = por %p1430_p8, %p1429_p4 }
  0x66   : > { %p1432_p6 = pnand %p1431_p13, %p1425_p0 }
  0x68   : > { %1435 = shalt.err (!%p1432_p6)
}
  0x69   : > { %s1436_s24 = scalar_lea.vmem %s1738_s6, 128  ;;  %s1532_s30 = smov [#allocation2]  }
  0x6a   : > { %p1437_p10 = scmp.ne.s32.totalorder %s1738_s6, %s1436_s24  ;;  %s1441_s14 = sshll.u32 %s1532_s30, 4  ;;  %s1442_s14 = int_to_ptr.vmem [resolvable:$false] %s1441_s14 }
  0x6b   : > { %s1443_s20 = scalar_lea.vmem %s1442_s14, 256  ;;  %p1444_p12 = scmp.lt.s32.totalorder %s1738_s6, %s1442_s14 }
  0x6c   : > { %p1439_p3 = pnand %p1437_p10, %p1423_p9  ;;  %p1445_p1 = scmp.lt.s32.totalorder %s1443_s20, %s1436_s24 }
  0x6e   : > { %p1440_p7 = pneg %p1439_p3  ;;  %p1446_p2 = por %p1445_p1, %p1444_p12 }
  0x70   : > { %p1447_p4 = pnand %p1446_p2, %p1440_p7 }
  0x72   : > { %1450 = shalt.err (!%p1447_p4)
}
  0x73   : > { %1269 = dma.hbm_to_vmem [thread:$0]  (!%p1734_p11), %s1732_s29, 128, %s1738_s6, %s195_s8  }
  0x74   : > { %p2042_p0 = scmp.ne.s32.totalorder %s2036_s23, 0 }
  0x75   : > { %s1768_s5 = sand.u32 (!%p2042_p0), 1, %s1517_s16   ;;  %p2043_p9 = scmp.ne.s32.totalorder (!%p2042_p0), %s2034_s21, 0 }
  0x76   : > { %215 = sbr.rel (%p2042_p0) target bundleno = 487 (0x1e7), region = 36  ;;  %s1202_s9 = sshll.u32 (!%p2042_p0), %s1768_s5, 3 }
  0x77   : > { %s218_s28 = scalar_lea.sflag (!%p2042_p0), [#allocation3], %s1768_s5  ;;  %s221_s11 = scalar_lea.vmem (!%p2042_p0), [#allocation2], %s1202_s9 }
  0x7d   : > { %1496 = dma.done.wait (%p2043_p9), %s218_s28, 128  }
  0x7e   : > { %1498 = vsyncadd (%p2043_p9), %s218_s28, 4294967168  ;;  %p2044_p8 = scmp.eq.s32.totalorder %s1590_s19, 0 }
  0x80   : > { %1500 = dma.done.wait (%p2044_p8), [#allocation6], 512   ;;  %p2045_p11 = pmov %p2044_p8 }
  0x81   : > { %p2046_p13 = pmov %p2044_p8 }
  0x82   : > { %1502 = vsyncadd (%p2045_p11), [#allocation6], 4294966784 }
  0x83   : > { %1504 = dma.done.wait (%p2046_p13), [#allocation9], 256   ;;  %p2047_p6 = pmov %p2044_p8 }
  0x84   : > { %v1533_v0 = vmov 0.0   ;;  %v1786_v1 = vld [vmem:[%s221_s11] sm:$0x77]  ;;  %v1534_v13 = vmov 683565275   ;;  %s1206_s21 = sshll.u32 %s1768_s5, 5 }
  0x85   : > { %1506 = vsyncadd (%p2047_p6), [#allocation9], 4294967040  ;;  %887 = vmatprep.mubr.f32.mxu1 %v1533_v0  ;;  %881 = vmatprep.mubr.f32.mxu0 %v1533_v0  ;;  %v264_v2 = vand.u32 2139095040, %v1786_v1  ;;  %v261_v4 = vand.u32 2147483647, %v1786_v1  ;;  %1329 = vrcp.f32 %v1786_v1  ;;  %vm263_vm7 = vcmp.lt.s32.totalorder %v1786_v1, 0 }
  0x86   : > { %v1535_v15 = vmov 2475754826   ;;  %v1536_v17 = vmov 2131351028   ;;  %v1537_v19 = vmov 2102212464   ;;  %vm353_vm10 = vweird.f32 %v1786_v1 }
  0x87   : > { %v265_v3 = vshrl.u32 %v264_v2, 23  ;;  %v268_v7 = vand.u32 8388607, %v261_v4  ;;  %v1538_v21 = vmov 920167782   ;;  %s257_s23 = scalar_lea.vmem [#allocation10], %s1206_s21 }
  0x88   : > { %v1539_v28 = vmov 1326507024   ;;  %vm262_vm8 = vcmp.le.f32.partialorder %v261_v4, 0.7853982  ;;  %s1090_s29 = sshll.u32 %s257_s23, 4  ;;  %s1233_s6 = sshll.u32 %s1590_s19, 8  ;;  %s1977_s29 = int_to_ptr.vmem [resolvable:$true] %s1090_s29 }
  0x89   : > { %v1207_v5 = vadd.s32 4294967169, %v265_v3  ;;  %v269_v10 = vor.u32 8388608, %v268_v7  ;;  %s1982_s26 = scalar_lea.hbm %s2030_s4, %s1233_s6  ;;  %s1077_s19 = scalar_lea.sflag [#allocation4], %s1768_s5 }
  0x8a   : > { %s1451_s25 = scalar_lea.vmem %s1977_s29, 512  ;;  %s1540_s27 = smov [#allocation10]  }
  0x8b   : > { %v271_v6 = vadd.s32 1, %v1207_v5  ;;  %v309_v30 = vshll.u32 %v269_v10, 8  ;;  %p1452_p10 = scmp.ne.s32.totalorder %s1977_s29, %s1451_s25  ;;  %s1455_s24 = sshll.u32 %s1540_s27, 4  ;;  %s1456_s24 = int_to_ptr.vmem [resolvable:$false] %s1455_s24 }
  0x8c   : > { %s1457_s30 = scalar_lea.vmem %s1456_s24, 1024  ;;  %p1458_p12 = scmp.lt.s32.totalorder %s1977_s29, %s1456_s24 }
  0x8d   : > { %vm272_vm0 = vcmp.gt.s32.totalorder %v271_v6, 0  ;;  %p1453_p3 = pnand %p1452_p10, %p1723_p5  ;;  %p1459_p1 = scmp.lt.s32.totalorder %s1457_s30, %s1451_s25 }
  0x8e   : > { %v273_v8 = vsel %vm272_vm0, %v271_v6, 0 }
  0x8f   : > { %v275_v9 = vand.u32 31, %v273_v8  ;;  %v274_v11 = vshrl.u32 %v273_v8, 5  ;;  %p1454_p7 = pneg %p1453_p3  ;;  %p1460_p2 = por %p1459_p1, %p1458_p12 }
  0x91   : > { %v276_v12 = vsub.s32 32, %v275_v9  ;;  %v278_v14 = vshll.u32 %v1534_v13, %v275_v9  ;;  %v281_v16 = vshll.u32 %v1535_v15, %v275_v9  ;;  %v284_v18 = vshll.u32 %v1536_v17, %v275_v9  ;;  %p1461_p4 = pnand %p1460_p2, %p1454_p7 }
  0x92   : > { %v287_v20 = vshll.u32 %v1537_v19, %v275_v9  ;;  %v290_v22 = vshll.u32 %v1538_v21, %v275_v9  ;;  %vm293_vm1 = vcmp.lt.s32.totalorder %v274_v11, 1  ;;  %vm296_vm2 = vcmp.lt.s32.totalorder %v274_v11, 4 }
  0x93   : > { %v277_v23 = vshrl.u32 %v1534_v13, %v276_v12  ;;  %v279_v24 = vshrl.u32 %v1535_v15, %v276_v12  ;;  %v282_v25 = vshrl.u32 %v1536_v17, %v276_v12  ;;  %v285_v26 = vshrl.u32 %v1537_v19, %v276_v12 }
  0x94   : > { %v288_v27 = vshrl.u32 %v1538_v21, %v276_v12  ;;  %v291_v29 = vshrl.u32 %v1539_v28, %v276_v12  ;;  %vm294_vm3 = vcmp.lt.s32.totalorder %v274_v11, 2  ;;  %vm295_vm4 = vcmp.lt.s32.totalorder %v274_v11, 3 }
  0x95   : > { %v280_v31 = vor.u32 %v279_v24, %v278_v14  ;;  %v283_v32 = vor.u32 %v282_v25, %v281_v16  ;;  %v286_v33 = vor.u32 %v285_v26, %v284_v18  ;;  %v526_v18 = vlaneseq }
  0x96   : > { %v289_v34 = vor.u32 %v288_v27, %v287_v20  ;;  %v292_v35 = vor.u32 %v291_v29, %v290_v22  ;;  %v1330_v22 = vpop.eup %1329 }
  0x97   : > { %v297_v36 = vsel %vm293_vm1, %v277_v23, %v280_v31  ;;  %v298_v37 = vsel %vm296_vm2, %v286_v33, 2102212464  ;;  %v301_v38 = vsel %vm293_vm1, %v280_v31, %v283_v32  ;;  %v305_v39 = vsel %vm293_vm1, %v283_v32, %v286_v33 }
  0x98   : > { %v299_v40 = vsel %vm295_vm4, %v283_v32, %v298_v37  ;;  %v302_v41 = vsel %vm296_vm2, %v289_v34, 920167782  ;;  %v306_v42 = vsel %vm296_vm2, %v292_v35, 1326507024  ;;  %v1807_v23 = vshrl.u32 %v526_v18, 7 }
  0x99   : > { %v303_v43 = vsel %vm295_vm4, %v286_v33, %v302_v41  ;;  %v307_v44 = vsel %vm295_vm4, %v289_v34, %v306_v42  ;;  %v300_v45 = vsel %vm294_vm3, %v297_v36, %v299_v40  ;;  %v483_v27 = vmul.f32 %v1330_v22, %v1330_v22 }
  0x9a   : > { %v304_v46 = vsel %vm294_vm3, %v301_v38, %v303_v43  ;;  %v308_v47 = vsel %vm294_vm3, %v305_v39, %v307_v44  ;;  %v316_v52 = vmul.u32 %v309_v30, %v300_v45  ;;  %v1810_v26 = vsub.s32 4, %v1807_v23 }
  0x9b   : > { %v1792_v48 = vmul.u32.u64.low %v309_v30, %v308_v47  ;;  %v1793_v49 = vmul.u32.u64.high %v309_v30, %v308_v47, %v1792_v48  ;;  %v1795_v50 = vmul.u32.u64.low %v309_v30, %v304_v46  ;;  %v1796_v51 = vmul.u32.u64.high %v309_v30, %v304_v46, %v1795_v50 }
  0x9c   : > { %v1813_v28 = vsub.s32 0, %v1807_v23  ;;  %vm528_vm9 = vcmp.eq.s32.totalorder %v1807_v23, 0  ;;  %v732_v30 = vrot.slane %v1330_v22, %v1810_v26  ;;  %v484_v31 = vmul.f32 %v1330_v22, %v483_v27 }
  0x9d   : > { %vm318_vm5 = vc.u32 %v1793_v49, %v1795_v50  ;;  %v319_v53 = vadd.s32 1, %v1796_v51  ;;  %v317_v2 = vadd.s32 %v1795_v50, %v1793_v49  ;;  %v1818_v32 = vsub.s32 1, %v1807_v23 }
  0x9e   : > { %v1824_v33 = vsel %vm528_vm9, 1.0, %v1533_v0  ;;  %vm530_vm11 = vcmp.eq.s32.totalorder %v1807_v23, 1  ;;  %v1828_v34 = vsub.s32 5, %v1807_v23  ;;  %v728_v35 = vrot.slane %v1330_v22, %v1813_v28 }
  0x9f   : > { %v320_v54 = vsel %vm318_vm5, %v319_v53, %v1796_v51  ;;  %v742_v37 = vrot.slane %v732_v30, %v1813_v28  ;;  %v753_v38 = vrot.slane %v483_v27, %v1810_v26  ;;  %v485_v41 = vmul.f32 %v1330_v22, %v484_v31 }
  0xa0   : > { %v321_v55 = vadd.s32 %v320_v54, %v316_v52  ;;  %v774_v43 = vrot.slane %v484_v31, %v1810_v26  ;;  %vm551_vm2 = vcmp.eq.s32.totalorder %v1807_v23, 2  ;;  %v738_v46 = vrot.slane %v728_v35, %v1813_v28 }
  0xa1   : > { %v749_v47 = vrot.slane %v483_v27, %v1813_v28  ;;  %v763_v50 = vrot.slane %v753_v38, %v1813_v28  ;;  %v770_v51 = vrot.slane %v484_v31, %v1813_v28  ;;  %vm573_vm3 = vcmp.eq.s32.totalorder %v1807_v23, 3 }
  0xa2   : > { %v322_v56 = vadd.s32 536870912, %v321_v55  ;;  %v744_v54 = vsel %vm528_vm9, %v742_v37, 0.0  ;;  %vm810_vm4 = vcmask 64512   ;;  %v808_v37 = vld [vmem:[#allocation5] sm:$0xff] }
  0xa4   : > { %v323_v57 = vshrl.u32 %v322_v56, 30  ;;  %v784_v56 = vrot.slane %v774_v43, %v1813_v28 }
  0xa6   : > { %v324_v58 = vshll.u32 %v323_v57, 30  ;;  %v347_v16 = vsub.s32 4, %v323_v57 }
  0xa8   : > { %v325_v59 = vsub.s32 %v321_v55, %v324_v58  ;;  %v348_v20 = vsel %vm263_vm7, %v347_v16, %v323_v57  ;;  %v795_v57 = vrot.slane %v485_v41, %v1810_v26  ;;  %v791_v58 = vrot.slane %v485_v41, %v1813_v28 }
  0xa9   : > { %v350_v24 = vsel %vm262_vm8, 0, %v348_v20 }
  0xaa   : > { %v327_v60 = vsub.s32 0, %v325_v59  ;;  %v467_v25 = vadd.s32 3, %v350_v24  ;;  %v354_v4 = vand.u32 3, %v350_v24  ;;  %v805_v22 = vrot.slane %v795_v57, %v1813_v28 }
  0xab   : > { %v801_v24 = vrot.slane %v791_v58, %v1813_v28 }
  0xac   : > { %v1208_v61 = vmin.u32 %v327_v60, %v325_v59  ;;  %v468_v29 = vand.u32 3, %v467_v25  ;;  %vm359_vm12 = vcmp.eq.s32.totalorder %v354_v4, 2  ;;  %vm356_vm14 = vcmp.eq.s32.totalorder %v354_v4, 0 }
  0xad   : > { %vm355_vm0 = vcmp.lt.s32.totalorder %v354_v4, 2 }
  0xae   : > { %v329_v62 = vclz %v1208_v61  ;;  %vm473_vm13 = vcmp.eq.s32.totalorder %v468_v29, 2  ;;  %vm470_vm15 = vcmp.eq.s32.totalorder %v468_v29, 0  ;;  %vm469_vm1 = vcmp.lt.s32.totalorder %v468_v29, 2 }
  0xb0   : > { %v1209_v63 = vadd.s32 4294967294, %v329_v62 }
  0xb2   : > { %vm1210_vm6 = vcmp.lt.s32.totalorder %v1209_v63, 0 }
  0xb3   : > { %v332_v3 = vsel %vm1210_vm6, 0, %v1209_v63  ;;  %v765_v63 = vsel %vm530_vm11, %v763_v50, %v744_v54 }
  0xb4   : > { %v333_v5 = vsub.s32 32, %v332_v3  ;;  %v334_v6 = vshll.u32 %v325_v59, %v332_v3  ;;  %v337_v7 = vsub.s32 4294967266, %v332_v3  ;;  %v759_v3 = vrot.slane %v749_v47, %v1813_v28 }
  0xb6   : > { %v335_v8 = vshrl.u32 %v317_v2, %v333_v5  ;;  %v338_v9 = vadd.s32 127, %v337_v7  ;;  %v743_v2 = vsel %vm528_vm9, %v738_v46, 0.0  ;;  %v780_v5 = vrot.slane %v770_v51, %v1813_v28 }
  0xb7   : > { %v764_v20 = vsel %vm530_vm11, %v759_v3, %v743_v2  ;;  %vm702_vm9 = vcmp.eq.s32.totalorder %v1807_v23, 6 }
  0xb8   : > { %v336_v10 = vor.u32 %v335_v8, %v334_v6  ;;  %v339_v11 = vshll.u32 %v338_v9, 23  ;;  %v785_v31 = vsel %vm551_vm2, %v780_v5, %v764_v20 }
  0xba   : > { %v340_v12 = vor.u32 4788187, %v339_v11  ;;  %v343_v13 = vcvt.s32.f32 %v336_v10 }
  0xbc   : > { %v341_v14 = vand.u32 2147483647, %v340_v12 }
  0xbe   : > { %v344_v15 = vmul.f32 %v343_v13, %v341_v14 }
  0xc0   : > { %v345_v17 = vxor.u32 2147483648, %v344_v15 }
  0xc2   : > { %v346_v19 = vsel %vm263_vm7, %v345_v17, %v344_v15  ;;  %vm658_vm7 = vcmp.eq.s32.totalorder %v1807_v23, 4 }
  0xc3   : > { %v349_v21 = vsel %vm262_vm8, %v1786_v1, %v346_v19  ;;  %vm680_vm8 = vcmp.eq.s32.totalorder %v1807_v23, 5 }
  0xc4   : > { %1331 = vcosq.f32 %v349_v21 }
  0xc5   : > { %1333 = vsinq.f32 %v349_v21  ;;  %v786_v21 = vsel %vm551_vm2, %v784_v56, %v765_v63 }
  0xc6   : > { %v807_v38 = vsel %vm573_vm3, %v805_v22, %v786_v21 }
  0xce   : > { %v1332_v36 = vpop.eup %1331 }
  0xcf   : > { %v1334_v39 = vpop.eup %1333  ;;  %v360_v40 = vxor.u32 2147483648, %v1332_v36 }
  0xd0   : > { %v357_v42 = vxor.u32 2147483648, %v1334_v39 }
  0xd1   : > { %v361_v44 = vsel %vm359_vm12, %v360_v40, %v1334_v39  ;;  %v475_v45 = vsel %vm473_vm13, %v360_v40, %v1334_v39  ;;  %v806_v39 = vsel %vm573_vm3, %v801_v24, %v785_v31 }
  0xd2   : > { %v358_v48 = vsel %vm356_vm14, %v1332_v36, %v357_v42  ;;  %v472_v49 = vsel %vm470_vm15, %v1332_v36, %v357_v42  ;;  %v809_v36 = vld [vmem:[#allocation5 + $0x8] sm:$0xff] }
  0xd3   : > { %v362_v52 = vsel %vm355_vm0, %v358_v48, %v361_v44  ;;  %v476_v53 = vsel %vm469_vm1, %v472_v49, %v475_v45  ;;  %v979_v44 = vld [vmem:[#allocation8] sm:$0xff] }
  0xd4   : > { %v1844_v55 = vsel %vm353_vm10, nan, %v362_v52  ;;  %v1857_v62 = vsel %vm353_vm10, nan, %v476_v53  ;;  %v980_v52 = vld [vmem:[#allocation8 + $0x8] sm:$0xff] }
  0xd5   : > { %v364_v59 = vmul.f32 %v1844_v55, %v1844_v55  ;;  %v538_v60 = vrot.slane %v1844_v55, %v1828_v34  ;;  %v534_v61 = vrot.slane %v1844_v55, %v1818_v32  ;;  %v486_v11 = vmul.f32 %v1857_v62, %v1857_v62 }
  0xd6   : > { %v488_v12 = vmul.f32 %v1857_v62, %v1844_v55  ;;  %v1215_v47 = vrot.slane %v1844_v55, 9  ;;  %v1216_v51 = vrot.slane %v1857_v62, 9 }
  0xd7   : > { %v365_v6 = vsub.f32 1.0, %v364_v59  ;;  %v481_v7 = vmul.f32 %v364_v59, %v1844_v55  ;;  %v548_v8 = vrot.slane %v538_v60, %v1818_v32  ;;  %v560_v9 = vrot.slane %v364_v59, %v1828_v34 }
  0xd8   : > { %v544_v1 = vrot.slane %v534_v61, %v1818_v32  ;;  %v556_v10 = vrot.slane %v364_v59, %v1818_v32  ;;  %v487_v29 = vsub.f32 %v364_v59, %v486_v11  ;;  %v489_v30 = vadd.f32 %v488_v12, %v488_v12 }
  0xd9   : > { %v366_v13 = vmax.f32 %v365_v6, 0.0  ;;  %v550_v14 = vsel %vm530_vm11, %v548_v8, %v1824_v33  ;;  %v570_v15 = vrot.slane %v560_v9, %v1818_v32  ;;  %v582_v16 = vrot.slane %v481_v7, %v1828_v34 }
  0xda   : > { %v549_v17 = vsel %vm530_vm11, %v544_v1, %v1824_v33  ;;  %v566_v18 = vrot.slane %v556_v10, %v1818_v32  ;;  %v578_v19 = vrot.slane %v481_v7, %v1818_v32  ;;  %v490_v40 = vmul.f32 %v487_v29, %v1844_v55 }
  0xdb   : > { %1335 = vrsqrt.f32 %v366_v13  ;;  %v572_v25 = vsel %vm551_vm2, %v570_v15, %v550_v14  ;;  %v592_v26 = vrot.slane %v582_v16, %v1818_v32  ;;  %v491_v41 = vmul.f32 %v489_v30, %v1857_v62 }
  0xdc   : > { %v571_v27 = vsel %vm551_vm2, %v566_v18, %v549_v17  ;;  %v588_v4 = vrot.slane %v578_v19, %v1818_v32  ;;  %v493_v42 = vmul.f32 %v489_v30, %v1844_v55  ;;  %v494_v43 = vmul.f32 %v487_v29, %v1857_v62 }
  0xdd   : > { %v594_v35 = vsel %vm573_vm3, %v592_v26, %v572_v25  ;;  %vm369_vm5 = vcmp.eq.f32.partialorder %v366_v13, inf  ;;  %v372_v46 = vand.u32 2147483648, %v366_v13  ;;  %v492_v48 = vsub.f32 %v490_v40, %v491_v41  ;;  %v894_v41 = vld [vmem:[#allocation7] sm:$0xff] }
  0xde   : > { %v593_v28 = vsel %vm573_vm3, %v588_v4, %v571_v27  ;;  %1234 = vmatprep.subr.mxu1 %v594_v35  ;;  %817 = vmatprep.subr.mxu0 %v594_v35  ;;  %vm371_vm6 = vcmp.eq.f32.partialorder %v366_v13, 0.0  ;;  %v495_v50 = vadd.f32 %v494_v43, %v493_v42  ;;  %v1217_v54 = vrot.slane %v487_v29, 9 }
  0xdf   : > { %1235 = vmatpush1.msra.mxu1 %v593_v28  ;;  %818 = vmatpush1.msra.mxu0 %v593_v28  ;;  %v1218_v56 = vrot.slane %v489_v30, 9  ;;  %v1219_v58 = vrot.slane %v492_v48, 9 }
  0xe0   : > { %1222 = vmatmul.mubr.msk.f32.vlgmr.msra.gmra.mrb[0].mxu1 %vm810_vm4, %v809_v36  ;;  %1221 = vmatmul.mubr.msk.f32.vlgmr.msra.gmra.mrb[0].mxu0 %vm810_vm4, %v808_v37  ;;  %v1220_v61 = vrot.slane %v495_v50, 9 }
  0xe1   : > { %966 = vmatprep.mubr.f32.mxu1 %v1533_v0  ;;  %987 = vmatprep.subr.mxu0 %v807_v38 }
  0xe2   : > { %988 = vmatpush1.msra.mxu0 %v806_v39  ;;  %1051 = vmatprep.mubr.f32.mxu0 %v1533_v0 }
  0xe4   : > { %1225 = vmatmul.mubr.msk.f32.vlgmr.msra.gmra.mrb[2].mxu0 %vm810_vm4, %v979_v44 }
  0xe5   : > { %v1336_v45 = vpop.eup %1335  ;;  %1057 = vmatprep.mubr.f32.mxu0 %v1533_v0 }
  0xe6   : > { %v368_v49 = vmul.f32 %v1336_v45, %v366_v13 }
  0xe8   : > { %v370_v53 = vsel %vm369_vm5, %v366_v13, %v368_v49  ;;  %1226 = vmatmul.mubr.msk.f32.gmra.mrb[4].mxu0 %vm810_vm4, %v980_v52 }
  0xe9   : > { %v373_v57 = vsel %vm371_vm6, %v372_v46, %v370_v53 }
  0xea   : > { %v500_v59 = vmul.f32 %v1215_v47, %v373_v57  ;;  %v480_v55 = vmul.f32 %v373_v57, %v373_v57  ;;  %v505_v60 = vmul.f32 %v1216_v51, %v373_v57 }
  0xec   : > { %v599_v62 = vrot.slane %v500_v59, %v1818_v32  ;;  %v482_v63 = vmul.f32 %v480_v55, %v373_v57  ;;  %v510_v2 = vmul.f32 %v1217_v54, %v480_v55  ;;  %v515_v3 = vmul.f32 %v1218_v56, %v480_v55 }
  0xed   : > { %v603_v5 = vrot.slane %v500_v59, %v1828_v34  ;;  %v624_v6 = vrot.slane %v505_v60, %v1828_v34  ;;  %v620_v7 = vrot.slane %v505_v60, %v1818_v32 }
  0xee   : > { %v609_v8 = vrot.slane %v599_v62, %v1818_v32  ;;  %v520_v9 = vmul.f32 %v1219_v58, %v482_v63  ;;  %v525_v1 = vmul.f32 %v1220_v61, %v482_v63  ;;  %v645_v10 = vrot.slane %v510_v2, %v1828_v34 }
  0xef   : > { %v613_v11 = vrot.slane %v603_v5, %v1818_v32  ;;  %v634_v12 = vrot.slane %v624_v6, %v1818_v32  ;;  %v667_v13 = vrot.slane %v515_v3, %v1828_v34  ;;  %v630_v14 = vrot.slane %v620_v7, %v1818_v32 }
  0xf0   : > { %v614_v15 = vsel %vm530_vm11, %v609_v8, %v1824_v33  ;;  %v655_v16 = vrot.slane %v645_v10, %v1818_v32  ;;  %v689_v17 = vrot.slane %v520_v9, %v1828_v34  ;;  %v711_v18 = vrot.slane %v525_v1, %v1828_v34 }
  0xf1   : > { %v615_v19 = vsel %vm530_vm11, %v613_v11, %v1824_v33  ;;  %v677_v20 = vrot.slane %v667_v13, %v1818_v32  ;;  %v635_v21 = vsel %vm551_vm2, %v630_v14, %v614_v15  ;;  %v641_v22 = vrot.slane %v510_v2, %v1818_v32 }
  0xf2   : > { %v636_v24 = vsel %vm551_vm2, %v634_v12, %v615_v19  ;;  %v699_v25 = vrot.slane %v689_v17, %v1818_v32  ;;  %v721_v26 = vrot.slane %v711_v18, %v1818_v32  ;;  %v663_v34 = vrot.slane %v515_v3, %v1818_v32 }
  0xf3   : > { %v657_v27 = vsel %vm573_vm3, %v655_v16, %v636_v24  ;;  %v651_v33 = vrot.slane %v641_v22, %v1818_v32  ;;  %v685_v4 = vrot.slane %v520_v9, %v1818_v32  ;;  %v707_v29 = vrot.slane %v525_v1, %v1818_v32 }
  0xf4   : > { %v679_v30 = vsel %vm658_vm7, %v677_v20, %v657_v27  ;;  %v673_v31 = vrot.slane %v663_v34, %v1818_v32 }
  0xf5   : > { %v701_v35 = vsel %vm680_vm8, %v699_v25, %v679_v30  ;;  %v656_v28 = vsel %vm573_vm3, %v651_v33, %v635_v21  ;;  %v695_v36 = vrot.slane %v685_v4, %v1818_v32  ;;  %v717_v37 = vrot.slane %v707_v29, %v1818_v32  ;;  %v895_v32 = vld [vmem:[#allocation7 + $0x8] sm:$0xff] }
  0xf6   : > { %v723_v38 = vsel %vm702_vm9, %v721_v26, %v701_v35  ;;  %v678_v39 = vsel %vm658_vm7, %v673_v31, %v656_v28 }
  0xf7   : > { %902 = vmatprep.subr.mxu1 %v723_v38  ;;  %v700_v40 = vsel %vm680_vm8, %v695_v36, %v678_v39 }
  0xf8   : > { %v722_v42 = vsel %vm702_vm9, %v717_v37, %v700_v40 }
  0xf9   : > { %903 = vmatpush1.msra.mxu1 %v722_v42 }
  0xfa   : > { %1223 = vmatmul.mubr.msk.f32.vlgmr.msra.gmra.mrb[2].mxu1 %vm810_vm4, %v894_v41 }
  0xfb   : > { %972 = vmatprep.mubr.f32.mxu1 %v1533_v0 }
  0xfe   : > { %1224 = vmatmul.mubr.msk.f32.gmra.mrb[4].mxu1 %vm810_vm4, %v895_v32 }
 0x1b3   : > { %v889_v43 = vpop.f32.mrb[0].mxu1  ;;  %v883_v44 = vpop.f32.mrb[0].mxu0 }
 0x1b4   : > { %v891_v45 = vpop.f32.mrb[1].mxu1  ;;  %v885_v46 = vpop.f32.mrb[1].mxu0 }
 0x1b7   : > { %v1053_v47 = vpop.f32.mrb[2].mxu0 }
 0x1b8   : > { %v1055_v48 = vpop.f32.mrb[3].mxu0 }
 0x1bb   : > { %v1059_v49 = vpop.f32.mrb[4].mxu0 }
 0x1bc   : > { %v1061_v50 = vpop.f32.mrb[5].mxu0 }
 0x1cd   : > { %v968_v23 = vpop.f32.mrb[2].mxu1 }
 0x1ce   : > { %v1064_v51 = vmul.f32 %v968_v23, %v883_v44  ;;  %v970_v52 = vpop.f32.mrb[3].mxu1 }
 0x1cf   : > { %v1065_v53 = vmul.f32 %v970_v52, %v885_v46 }
 0x1d0   : > { %v1068_v54 = vmul.f32 %v1064_v51, %v1053_v47 }
 0x1d1   : > { %v1069_v0 = vmul.f32 %v1065_v53, %v1055_v48  ;;  %v974_v56 = vpop.f32.mrb[4].mxu1 }
 0x1d2   : > { %1072 = vst [vmem:[%s257_s23] sm:$0xff] %v1068_v54  ;;  %v1066_v57 = vmul.f32 %v974_v56, %v889_v43  ;;  %v976_v58 = vpop.f32.mrb[5].mxu1 }
 0x1d3   : > { %1073 = vst [vmem:[%s257_s23 + $0x8] sm:$0xff] %v1069_v0  ;;  %v1067_v59 = vmul.f32 %v976_v58, %v891_v45 }
 0x1d4   : > { %v1070_v55 = vmul.f32 %v1066_v57, %v1059_v49 }
 0x1d5   : > { %v1071_v60 = vmul.f32 %v1067_v59, %v1061_v50 }
 0x1d6   : > { %1074 = vst [vmem:[%s257_s23 + $0x10] sm:$0xff] %v1070_v55 }
 0x1d7   : > { %1075 = vst [vmem:[%s257_s23 + $0x18] sm:$0xff] %v1071_v60 }
 0x1d8   : > { %1464 = shalt.err (!%p1461_p4)
}
 0x1d9   : > { %s1465_s14 = scalar_lea.hbm %s1982_s26, 512  ;;  %s1469_s28 = scalar_lea.hbm %s2030_s4, 1024 }
 0x1da   : > { %p1466_p0 = scmp.ne.s32.totalorder %s1982_s26, %s1465_s14  ;;  %p1470_p11 = scmp.lt.u32.totalorder %s1982_s26, %s2030_s4 }
 0x1db   : > { %p1471_p13 = scmp.lt.u32.totalorder %s1469_s28, %s1465_s14  ;;  %p1473_p10 = scmp.lt.u32.totalorder %s1465_s14, %s1982_s26 }
 0x1dc   : > { %p1467_p9 = pnand %p1466_p0, %p1723_p5 }
 0x1dd   : > { %p1472_p6 = por %p1471_p13, %p1470_p11 }
 0x1de   : > { %p1468_p8 = pneg %p1467_p9 }
 0x1df   : > { %p1474_p3 = por %p1473_p10, %p1472_p6 }
 0x1e1   : > { %p1475_p7 = pnand %p1474_p3, %p1468_p8 }
 0x1e3   : > { %1478 = shalt.err (!%p1475_p7)
}
 0x1e4   : > { %s1541_s23 = smov 256   ;;  %s1542_s6 = smov 512  }
 0x1e5   : > { %s1543_s7 = smov 16  }
 0x1e6   : > { %1254 = dma.vmem_to_hbm [thread:$0]  (%p1723_p5), %s1977_s29, 512, %s1982_s26, %s1077_s19, %s1541_s23, %s1542_s6, %s1543_s7  }
 0x1e7 PF: > { %s1105_s8 = sand.u32 1, %s1513_s15   ;;  %p2048_p12 = scmp.ne.s32.totalorder %s2035_s22, 0 }
 0x1e8   : > { %p2049_p1 = scmp.ge.s32.totalorder %s1525_s18, 2  ;;  %s1106_s25 = scalar_lea.sflag [#allocation4], %s1105_s8 }
 0x1ea   : > { %p1271_p2 = pnand %p2049_p1, %p2048_p12 }
 0x1ec   : > { %1508 = dma.done.wait (!%p1271_p2), %s1106_s25, 512  }
 0x1ed   : > { %1510 = vsyncadd (!%p1271_p2), %s1106_s25, 4294966784  ;;  %p19_p4 = scmp.ge.s32.totalorder %s1709_s10, 4   ;;  %s2050_s15 = smov %s1517_s16 }
 0x1ee   : > { %s2051_s16 = smov %s1521_s17  ;;  %s2052_s17 = smov %s1719_s12 }
 0x1ef   : > { %s2053_s18 = smov %s1709_s10  ;;  %21 = sbr.rel (!%p19_p4) target bundleno = 7 (0x7), region = 93 }
 0x1f6   :  { %1111 = vsyncpa [#allocation3], 1 }
 0x1f7   :  { %1113 = vsyncpa [#allocation3 + $0x1], 1 }
 0x1f8   :  { %1114 = vsyncpa [#allocation6], 1 }
 0x1f9   :  { %1115 = vsyncpa [#allocation9], 1 }
 0x1fa   :  { %1116 = vsyncpa [#allocation4], 1 }
 0x1fb   :  { %1118 = vsyncpa [#allocation4 + $0x1], 1 }

</bundles_post_ra>
